<compile_context>
chip_gen: v7x
topology: tpu7x:2x2x1
jax: 0.10.0
libtpu: 0.0.40
codegen_flags: <defaults>
</compile_context>

<pallas_src>
import functools

import jax
import jax.numpy as jnp
from jax.experimental import pallas as pl
from jax.experimental.pallas import tpu as pltpu


def _round_up(x, m):
    return (x + m - 1) // m * m


def _pick_tile(p, ch, bs, itemsize, *, target_bytes=2 << 20, min_steps=4):
    """Pixel-tile width: ~target_bytes per (C, tm) slab, multiple of 128,
    capped so the grid keeps at least `min_steps` steps (>= 2*num_cores so
    v7x's two TensorCores both get work)."""
    tm = max(128, (target_bytes // (ch * itemsize)) // 128 * 128)
    tm = min(tm, _round_up(p, 128))
    while tm > 128 and bs * pl.cdiv(p, tm) < min_steps:
        tm = _round_up(tm // 2, 128)
    return tm


# --------------------------------------------------------------------------
# Pallas kernel: one (batch, pixel-tile) grid step = full GDN on a (C, TM) slab
# --------------------------------------------------------------------------
def _gdn_kernel(x_ref, gamma_ref, beta_ref, o_ref, *, inverse):
    # (1, C, TM) activation tile, pixels on the 128-lane axis.  Upcast to f32
    # in-register so bf16 inputs pay only bf16 HBM traffic.
    x = x_ref[0].astype(jnp.float32)                                 # (C, TM)
    # norm[i, p] = beta[i] + sum_j gamma[i, j] * x[j, p]^2   (1x1 conv over C)
    norm = jnp.dot(gamma_ref[...], x * x,
                   preferred_element_type=jnp.float32) + beta_ref[...]
    if inverse:
        y = x * jnp.sqrt(norm)                  # IGDN
    else:
        y = x * jax.lax.rsqrt(norm)             # x / sqrt(norm); rsqrt -> EUP
    o_ref[0] = y.astype(o_ref.dtype)


# --------------------------------------------------------------------------
# Wrapper: handles 4D (B,C,H,W) and 5D (B,C,D,W,H) inputs like the module
# --------------------------------------------------------------------------
def gdn(x, beta, gamma, *, inverse=False, beta_min=1e-6,
        reparam_offset=2.0 ** (-18), tm=None):
    """GDN forward.  x: (B,C,D,W,H) or (B,C,H,W);  beta: (C,);  gamma: (C,C).
    Output has the same shape and dtype as x."""
    orig_shape = x.shape
    if x.ndim == 5:
        bs, ch, d, w, h = x.shape
        p = d * w * h
    elif x.ndim == 4:
        bs, ch, hh, ww = x.shape
        p = hh * ww
    else:
        raise ValueError(f"expected 4D or 5D input, got {x.shape}")
    x3 = x.reshape(bs, ch, p)        # free reshape: no transpose, no pad, no cast

    if tm is None:
        tm = _pick_tile(p, ch, bs, x3.dtype.itemsize)
    else:
        tm = min(_round_up(tm, 128), _round_up(p, 128))
    n_tiles = pl.cdiv(p, tm)         # ragged last tile is masked by Pallas

    # Parameter re-parameterization (LowerBound -> ^2 - pedestal), identical to
    # the PyTorch module.  O(C^2): done once here, not per grid step.
    pedestal = float(reparam_offset) ** 2
    beta_bound = (beta_min + pedestal) ** 0.5
    gamma_bound = float(reparam_offset)
    beta_t = (jnp.square(jnp.maximum(beta.astype(jnp.float32), beta_bound))
              - pedestal).reshape(ch, 1)
    gamma_t = (jnp.square(jnp.maximum(gamma.astype(jnp.float32), gamma_bound))
               - pedestal)

    out = pl.pallas_call(
        functools.partial(_gdn_kernel, inverse=inverse),
        out_shape=jax.ShapeDtypeStruct((bs, ch, p), x3.dtype),
        grid_spec=pltpu.PrefetchScalarGridSpec(
            num_scalar_prefetch=0,
            grid=(bs, n_tiles),
            in_specs=[
                pl.BlockSpec((1, ch, tm), lambda b, i: (b, 0, i)),   # activation
                pl.BlockSpec((ch, ch), lambda b, i: (0, 0)),         # gamma_t
                pl.BlockSpec((ch, 1), lambda b, i: (0, 0)),          # beta_t
            ],
            out_specs=pl.BlockSpec((1, ch, tm), lambda b, i: (b, 0, i)),
        ),
        compiler_params=pltpu.CompilerParams(
            dimension_semantics=("parallel", "parallel")),
    )(x3, gamma_t, beta_t)

    return out.reshape(orig_shape)


# --------------------------------------------------------------------------
# Pure-JAX reference (PyTorch semantics) and parameter init (module defaults)
# --------------------------------------------------------------------------
def gdn_reference(x, beta, gamma, *, inverse=False, beta_min=1e-6,
                  reparam_offset=2.0 ** (-18)):
    bs, ch = x.shape[:2]
    p = 1
    for s in x.shape[2:]:
        p *= s
    xf = x.reshape(bs, ch, p).astype(jnp.float32)
    pedestal = reparam_offset ** 2
    beta_bound = (beta_min + pedestal) ** 0.5
    gamma_bound = reparam_offset
    beta_t = jnp.square(jnp.maximum(beta.astype(jnp.float32), beta_bound)) - pedestal
    gamma_t = jnp.square(jnp.maximum(gamma.astype(jnp.float32), gamma_bound)) - pedestal
    norm = jnp.sqrt(jnp.einsum("ij,bjp->bip", gamma_t, xf * xf,
                               precision=jax.lax.Precision.HIGHEST)
                    + beta_t[None, :, None])
    y = xf * norm if inverse else xf / norm
    return y.reshape(x.shape)


def init_gdn_params(ch, *, gamma_init=0.1, reparam_offset=2.0 ** (-18), key=None):
    pedestal = reparam_offset ** 2
    beta = jnp.sqrt(jnp.ones((ch,), jnp.float32) + pedestal)
    gamma = jnp.sqrt(gamma_init * jnp.eye(ch, dtype=jnp.float32) + pedestal)
    if key is not None:  # small positive perturbation so channel mixing is nontrivial
        kb, kg = jax.random.split(key)
        beta = beta + 0.05 * jax.random.uniform(kb, (ch,), jnp.float32)
        gamma = gamma + 0.01 * jax.random.uniform(kg, (ch, ch), jnp.float32)
    return beta, gamma


if __name__ == "__main__":
    key = jax.random.PRNGKey(0)
    k_x, k_p = jax.random.split(key)

    # 5D input exercises the module's "unfold" branch; P = 4*16*15 = 960 is NOT
    # a multiple of 128, exercising the pad-free ragged-edge (masked) path.
    bs, ch, d, w, h = 2, 64, 4, 16, 15
    beta, gamma = init_gdn_params(ch, key=k_p)
    x = jax.random.normal(k_x, (bs, ch, d, w, h), dtype=jnp.float32)

    fwd = jax.jit(functools.partial(gdn, inverse=False))
    out = jax.block_until_ready(fwd(x, beta, gamma))
    assert out.shape == x.shape and out.dtype == x.dtype
    ref = gdn_reference(x, beta, gamma, inverse=False)
    err = float(jnp.max(jnp.abs(out - ref)) / (jnp.max(jnp.abs(ref)) + 1e-12))
    assert err < 2e-3, f"f32 forward max relative error {err}"

    # bf16 IGDN (inverse) smoke test on a 4D input: dtype is preserved and only
    # bf16 bytes cross HBM; ragged P = 480 again exercises the masked tail.
    x4 = jax.random.normal(k_x, (bs, ch, 24, 20), dtype=jnp.float32)
    x4_bf = x4.astype(jnp.bfloat16)
    inv = jax.jit(functools.partial(gdn, inverse=True))
    out_bf = jax.block_until_ready(inv(x4_bf, beta, gamma))
    assert out_bf.shape == x4_bf.shape and out_bf.dtype == jnp.bfloat16
    ref_bf = gdn_reference(x4_bf, beta, gamma, inverse=True)
    err_bf = float(jnp.max(jnp.abs(out_bf.astype(jnp.float32) - ref_bf))
                   / (jnp.max(jnp.abs(ref_bf)) + 1e-12))
    assert err_bf < 2e-2, f"bf16 inverse max relative error {err_bf}"

    print("KERNEL_OK")
</pallas_src>

<mosaic_0001>
module attributes {stable_mosaic.version = 11 : i64} {
  func.func @_gdn_kernel(%arg0: i32, %arg1: i32, %arg2: memref<1x64x512xf32, #tpu.memory_space<vmem>>, %arg3: memref<64x64xf32, #tpu.memory_space<vmem>>, %arg4: memref<64x1xf32, #tpu.memory_space<vmem>>, %arg5: memref<1x64x512xf32, #tpu.memory_space<vmem>>) attributes {dimension_semantics = [#tpu.dimension_semantics<parallel>, #tpu.dimension_semantics<parallel>], iteration_bounds = array<i64: 2, 2>, scalar_prefetch = 0 : i64, scratch_operands = 0 : i64, tpu.core_type = #tpu.core_type<tc>, window_params = [{transform_indices = @transform_0, window_bounds = array<i64: 1, 64, 512>}, {pipeline_mode = #tpu.pipeline_mode<synchronous>, transform_indices = @transform_1, window_bounds = array<i64: 64, 64>}, {pipeline_mode = #tpu.pipeline_mode<synchronous>, transform_indices = @transform_2, window_bounds = array<i64: 64, 1>}, {transform_indices = @transform_3, window_bounds = array<i64: 1, 64, 512>}]} {
    %c0 = arith.constant 0 : index
    %c0_0 = arith.constant 0 : index
    %c0_1 = arith.constant 0 : index
    %0 = vector.load %arg2[%c0, %c0_0, %c0_1] : memref<1x64x512xf32, #tpu.memory_space<vmem>>, vector<1x64x512xf32>
    %1 = vector.shape_cast %0 : vector<1x64x512xf32> to vector<64x512xf32>
    %c0_2 = arith.constant 0 : index
    %c0_3 = arith.constant 0 : index
    %2 = vector.load %arg3[%c0_2, %c0_3] : memref<64x64xf32, #tpu.memory_space<vmem>>, vector<64x64xf32>
    %3 = arith.mulf %1, %1 : vector<64x512xf32>
    %cst = arith.constant dense<0.000000e+00> : vector<64x512xf32>
    %4 = tpu.matmul %2, %3, %cst {dimension_numbers = #tpu.dot_dimension_numbers<[1], [0], [0], [1], [0, 0, 1, 1], [], []>} : vector<64x64xf32>, vector<64x512xf32>, vector<64x512xf32> -> vector<64x512xf32>
    %c0_4 = arith.constant 0 : index
    %c0_5 = arith.constant 0 : index
    %5 = vector.load %arg4[%c0_4, %c0_5] : memref<64x1xf32, #tpu.memory_space<vmem>>, vector<64x1xf32>
    %6 = vector.broadcast %5 : vector<64x1xf32> to vector<64x512xf32>
    %7 = arith.addf %4, %6 : vector<64x512xf32>
    %8 = math.rsqrt %7 : vector<64x512xf32>
    %9 = arith.mulf %1, %8 : vector<64x512xf32>
    %c0_6 = arith.constant 0 : index
    %c0_7 = arith.constant 0 : index
    %c0_8 = arith.constant 0 : index
    %10 = vector.load %arg5[%c0_6, %c0_7, %c0_8] : memref<1x64x512xf32, #tpu.memory_space<vmem>>, vector<1x64x512xf32>
    %11 = vector.shape_cast %10 : vector<1x64x512xf32> to vector<64x512xf32>
    %12 = vector.shape_cast %9 : vector<64x512xf32> to vector<1x64x512xf32>
    tpu.vector_store %arg5[%c0_6, %c0_7, %c0_8], %12 {strides = array<i32>} : memref<1x64x512xf32, #tpu.memory_space<vmem>>, vector<1x64x512xf32>,
    return
  }
  func.func @transform_0(%arg0: i32, %arg1: i32) -> (i32, i32, i32) {
    %c0_i32 = arith.constant 0 : i32
    %c0_i32_0 = arith.constant 0 : i32
    return %arg0, %c0_i32, %arg1 : i32, i32, i32
  }
  func.func @transform_1(%arg0: i32, %arg1: i32) -> (i32, i32) {
    %c0_i32 = arith.constant 0 : i32
    %c0_i32_0 = arith.constant 0 : i32
    %c0_i32_1 = arith.constant 0 : i32
    return %c0_i32, %c0_i32_0 : i32, i32
  }
  func.func @transform_2(%arg0: i32, %arg1: i32) -> (i32, i32) {
    %c0_i32 = arith.constant 0 : i32
    %c0_i32_0 = arith.constant 0 : i32
    %c0_i32_1 = arith.constant 0 : i32
    return %c0_i32, %c0_i32_0 : i32, i32
  }
  func.func @transform_3(%arg0: i32, %arg1: i32) -> (i32, i32, i32) {
    %c0_i32 = arith.constant 0 : i32
    %c0_i32_0 = arith.constant 0 : i32
    return %arg0, %c0_i32, %arg1 : i32, i32, i32
  }
}

</mosaic_0001>

<bundles_post_ra>
// kernel: gdn.1
= control target key start
LH: loop header
LB: loop body
LE: loop exit
PB: predicated region body
PF: predicated region fallthrough
CT: control target
= control target key end

     0   :  { %s1166_s12 = smov 0   ;;  %s1168_s13 = smov 0   ;;  %s1708_s0 = inlined_call_operand.vmem [shape: f32[2,64,960], index: 0, kind: input, shape index: {}]   ;;  %s1709_s1 = inlined_call_operand.vmem [shape: f32[64,64], index: 1, kind: input, shape index: {}]   ;;  %s1710_s2 = inlined_call_operand.vmem [shape: f32[64,1], index: 2, kind: input, shape index: {}]   ;;  %s1711_s3 = inlined_call_operand.vmem [shape: f32[2,64,960], index: 3, kind: output, shape index: {}]  }
   0x1   :  { %s1170_s14 = smov 0   ;;  %s1172_s15 = smov 0  }
   0x2   :  { %s1174_s16 = smov 0   ;;  %s1176_s17 = smov 0  }
   0x3   :  { %s1178_s18 = smov 0  }
   0x4 LB: > { %s22_s19 = sadd.s32 1, %s1134_s16  ;;  %s25_s20 = sadd.s32 1, %s1138_s17  ;;  %s1142_s18 = sphi %s1178_s18, %s13_s18   ;;  %s1138_s17 = sphi %s1176_s17, %s1718_s17   ;;  %s1134_s16 = sphi %s1174_s16, %s1717_s16   ;;  %s1130_s15 = sphi %s1172_s15, %s1716_s15   ;;  %s1126_s14 = sphi %s1170_s14, %s1715_s14   ;;  %s1122_s13 = sphi %s1168_s13, %s1714_s13   ;;  %s1118_s12 = sphi %s1166_s12, %s1713_s12  }
   0x5   : > { %p23_p0 = scmp.ge.s32.totalorder %s22_s19, 2  ;;  %s899_s21 = sadd.s32 4294967295, %s1142_s18  }
   0x6   : > { %p41_p1 = scmp.ne.s32.totalorder %s1122_s13, %s1118_s12  ;;  %p42_p2 = scmp.eq.s32.totalorder %s1142_s18, 0 }
   0x7   : > { %s1720_s19 = smov (%p23_p0, %s22_s19), 0  ;;  %s1722_s20 = smov (!%p23_p0, %s25_s20), %s1138_s17 }
   0x8   : > { %p27_p3 = scmp.ge.s32.totalorder %s1722_s20, 2  ;;  %p115_p4 = scmp.eq.s32.totalorder %s899_s21, 3 }
   0x9   : > { %s30_s22 = ssub.s32 %s1134_s16, %s1720_s19  ;;  %p43_p5 = por %p42_p2, %p41_p1 }
   0xa   : > { %s1724_s20 = smov (%p27_p3, %s1722_s20), 0  ;;  %p1214_p6 = por %p115_p4, %p41_p1 }
   0xb   : > { %s29_s24 = ssub.s32 %s1138_s17, %s1724_s20  ;;  %s34_s26 = sadd.s32 1, %s1122_s13 }
   0xc   : > { %s31_s25 = sor.u32 %s30_s22, %s29_s24  ;;  %p902_p8 = scmp.ge.s32.totalorder %s1142_s18, 4 }
   0xd   : > { %p32_p7 = scmp.eq.s32.totalorder %s31_s25, 0 }
   0xe   : > { %143 = sbr.rel (%p902_p8) target bundleno = 44 (0x2c), region = 24 }
   0xf   : > { %s1222_s27 = scalar_select %p32_p7, %s1122_s13, %s34_s26  }
  0x15   : > { %146 = sbr.rel (!%p43_p5) target bundleno = 44 (0x2c), region = 28  ;;  %s148_s28 = sand.u32 (%p43_p5), 1, %s1122_s13  }
  0x16   : > { %s904_s29 = sshll.u32 (%p43_p5), %s1134_s16, 2  ;;  %s903_s30 = sshll.u32 (%p43_p5), %s148_s28, 8 }
  0x17   : > { %s905_s4 = sshll.u32 (%p43_p5), %s1138_s17, 6  ;;  %s1236_s10 = scalar_lea.vmem (%p43_p5), [#allocation2], %s903_s30 }
  0x18   : > { %s153_s5 = sadd.s32 (%p43_p5), %s905_s4, %s904_s29 }
  0x19   : > { %s906_s6 = sshll.u32 (%p43_p5), %s153_s5, 3 }
  0x1a   : > { %s1231_s9 = scalar_lea.vmem (%p43_p5), %s1708_s0, %s906_s6 }
  0x1b   : > { %v168_v0 = vld [vmem:[%s1231_s9] sm:$0xff] (%p43_p5)  ;;  %v170_v1 = vld [vmem:[%s1231_s9 + $0x8] sm:$0xff] (%p43_p5)  ;;  %v172_v2 = vld [vmem:[%s1231_s9 + $0x10] sm:$0xff] (%p43_p5) }
  0x1c   : > { %169 = vst [vmem:[%s1236_s10] sm:$0xff] %v168_v0  ;;  %171 = vst [vmem:[%s1236_s10 + $0x8] sm:$0xff] %v170_v1  ;;  %v174_v3 = vld [vmem:[%s1231_s9 + $0x18] sm:$0xff]  ;;  %v176_v4 = vld [vmem:[%s1231_s9 + $0x40] sm:$0xff] }
  0x1d   : > { %173 = vst [vmem:[%s1236_s10 + $0x10] sm:$0xff] %v172_v2  ;;  %v178_v5 = vld [vmem:[%s1231_s9 + $0x48] sm:$0xff]  ;;  %175 = vst [vmem:[%s1236_s10 + $0x18] sm:$0xff] %v174_v3  ;;  %v180_v6 = vld [vmem:[%s1231_s9 + $0x50] sm:$0xff] }
  0x1e   : > { %177 = vst [vmem:[%s1236_s10 + $0x20] sm:$0xff] %v176_v4  ;;  %179 = vst [vmem:[%s1236_s10 + $0x28] sm:$0xff] %v178_v5  ;;  %v182_v7 = vld [vmem:[%s1231_s9 + $0x58] sm:$0xff]  ;;  %v184_v8 = vld [vmem:[%s1231_s9 + $0x80] sm:$0xff] }
  0x1f   : > { %181 = vst [vmem:[%s1236_s10 + $0x30] sm:$0xff] %v180_v6  ;;  %183 = vst [vmem:[%s1236_s10 + $0x38] sm:$0xff] %v182_v7  ;;  %v186_v9 = vld [vmem:[%s1231_s9 + $0x88] sm:$0xff]  ;;  %v188_v10 = vld [vmem:[%s1231_s9 + $0x90] sm:$0xff] }
  0x20   : > { %185 = vst [vmem:[%s1236_s10 + $0x40] sm:$0xff] %v184_v8  ;;  %v190_v11 = vld [vmem:[%s1231_s9 + $0x98] sm:$0xff]  ;;  %187 = vst [vmem:[%s1236_s10 + $0x48] sm:$0xff] %v186_v9  ;;  %v192_v12 = vld [vmem:[%s1231_s9 + $0xc0] sm:$0xff] }
  0x21   : > { %189 = vst [vmem:[%s1236_s10 + $0x50] sm:$0xff] %v188_v10  ;;  %191 = vst [vmem:[%s1236_s10 + $0x58] sm:$0xff] %v190_v11  ;;  %v194_v13 = vld [vmem:[%s1231_s9 + $0xc8] sm:$0xff]  ;;  %v196_v14 = vld [vmem:[%s1231_s9 + $0xd0] sm:$0xff] }
  0x22   : > { %193 = vst [vmem:[%s1236_s10 + $0x60] sm:$0xff] %v192_v12  ;;  %195 = vst [vmem:[%s1236_s10 + $0x68] sm:$0xff] %v194_v13  ;;  %v198_v15 = vld [vmem:[%s1231_s9 + $0xd8] sm:$0xff]  ;;  %v200_v16 = vld [vmem:[%s1231_s9 + $0x100] sm:$0xff] }
  0x23   : > { %197 = vst [vmem:[%s1236_s10 + $0x70] sm:$0xff] %v196_v14  ;;  %v202_v17 = vld [vmem:[%s1231_s9 + $0x108] sm:$0xff]  ;;  %199 = vst [vmem:[%s1236_s10 + $0x78] sm:$0xff] %v198_v15  ;;  %v204_v18 = vld [vmem:[%s1231_s9 + $0x110] sm:$0xff] }
  0x24   : > { %201 = vst [vmem:[%s1236_s10 + $0x80] sm:$0xff] %v200_v16  ;;  %203 = vst [vmem:[%s1236_s10 + $0x88] sm:$0xff] %v202_v17  ;;  %v206_v19 = vld [vmem:[%s1231_s9 + $0x118] sm:$0xff]  ;;  %v208_v20 = vld [vmem:[%s1231_s9 + $0x140] sm:$0xff] }
  0x25   : > { %205 = vst [vmem:[%s1236_s10 + $0x90] sm:$0xff] %v204_v18  ;;  %207 = vst [vmem:[%s1236_s10 + $0x98] sm:$0xff] %v206_v19  ;;  %v210_v21 = vld [vmem:[%s1231_s9 + $0x148] sm:$0xff]  ;;  %v212_v22 = vld [vmem:[%s1231_s9 + $0x150] sm:$0xff] }
  0x26   : > { %209 = vst [vmem:[%s1236_s10 + $0xa0] sm:$0xff] %v208_v20  ;;  %v214_v23 = vld [vmem:[%s1231_s9 + $0x158] sm:$0xff]  ;;  %211 = vst [vmem:[%s1236_s10 + $0xa8] sm:$0xff] %v210_v21  ;;  %v216_v24 = vld [vmem:[%s1231_s9 + $0x180] sm:$0xff] }
  0x27   : > { %213 = vst [vmem:[%s1236_s10 + $0xb0] sm:$0xff] %v212_v22  ;;  %215 = vst [vmem:[%s1236_s10 + $0xb8] sm:$0xff] %v214_v23  ;;  %v218_v25 = vld [vmem:[%s1231_s9 + $0x188] sm:$0xff]  ;;  %v220_v26 = vld [vmem:[%s1231_s9 + $0x190] sm:$0xff] }
  0x28   : > { %217 = vst [vmem:[%s1236_s10 + $0xc0] sm:$0xff] %v216_v24  ;;  %219 = vst [vmem:[%s1236_s10 + $0xc8] sm:$0xff] %v218_v25  ;;  %v222_v27 = vld [vmem:[%s1231_s9 + $0x198] sm:$0xff]  ;;  %v224_v28 = vld [vmem:[%s1231_s9 + $0x1c0] sm:$0xff] }
  0x29   : > { %221 = vst [vmem:[%s1236_s10 + $0xd0] sm:$0xff] %v220_v26  ;;  %v226_v29 = vld [vmem:[%s1231_s9 + $0x1c8] sm:$0xff]  ;;  %223 = vst [vmem:[%s1236_s10 + $0xd8] sm:$0xff] %v222_v27  ;;  %v228_v30 = vld [vmem:[%s1231_s9 + $0x1d0] sm:$0xff] }
  0x2a   : > { %225 = vst [vmem:[%s1236_s10 + $0xe0] sm:$0xff] %v224_v28  ;;  %227 = vst [vmem:[%s1236_s10 + $0xe8] sm:$0xff] %v226_v29  ;;  %v230_v31 = vld [vmem:[%s1231_s9 + $0x1d8] sm:$0xff] }
  0x2b   : > { %229 = vst [vmem:[%s1236_s10 + $0xf0] sm:$0xff] %v228_v30  ;;  %231 = vst [vmem:[%s1236_s10 + $0xf8] sm:$0xff] %v230_v31 }
  0x2c PF: > { %p907_p9 = scmp.ge.s32.totalorder %s1142_s18, 1  ;;  %p236_p10 = scmp.lt.s32.totalorder %s1142_s18, 5 }
  0x2e   : > { %p237_p11 = pnand %p907_p9, %p236_p10 }
  0x2f   : > { %s243_s11 = sand.u32 (!%p237_p11), 1, %s1118_s12   ;;  %v1144_v32 = vmov (!%p237_p11), 0.0   ;;  %v1145_v33 = vmov (!%p237_p11), 0   ;;  %v339_v34 = vld [vmem:[%s1710_s2] sm:$0xff] (!%p237_p11)  ;;  %vm387_vm0 = vcmask (!%p237_p11), 523264  }
  0x30   : > { %240 = sbr.rel (%p237_p11) target bundleno = 341 (0x155), region = 51  ;;  %s1302_s21 = sshll.u32 (!%p237_p11), %s243_s11, 8  ;;  %476 = vmatprep.mubr.f32.mxu0 (!%p237_p11), %v1144_v32  ;;  %589 = vmatprep.mubr.f32.mxu1 (!%p237_p11), %v1144_v32 }
  0x31   : > { %1022 = vset.pattern.permute.xlu0 (!%p237_p11), %v1145_v33  ;;  %1023 = vset.pattern.permute.xlu1 (!%p237_p11), %v1145_v33  ;;  %s1310_s25 = scalar_lea.vmem (!%p237_p11), [#allocation2], %s1302_s21  ;;  %s1550_s24 = scalar_lea.vmem (!%p237_p11), [#allocation3], %s1302_s21 }
  0x32   : > { %v1313_v35 = vld [vmem:[%s1310_s25 + $0x8] sm:$0xff] (!%p237_p11)  ;;  %v1319_v37 = vld [vmem:[%s1310_s25 + $0x18] sm:$0xff] (!%p237_p11)  ;;  %349 = vperm.xlu0 (!%p237_p11), %1022, %v339_v34   ;;  %v1331_v42 = vld [vmem:[%s1310_s25] sm:$0xff] (!%p237_p11) }
  0x33   : > { %v1316_v36 = vld [vmem:[%s1310_s25 + $0x28] sm:$0xff] (!%p237_p11)  ;;  %v308_v38 = vmul.f32 (!%p237_p11), %v1313_v35, %v1313_v35  ;;  %v1326_v40 = vld [vmem:[%s1310_s25 + $0x38] sm:$0xff] (!%p237_p11)  ;;  %v310_v41 = vmul.f32 (!%p237_p11), %v1319_v37, %v1319_v37  ;;  %v1334_v43 = vld [vmem:[%s1310_s25 + $0x20] sm:$0xff] (!%p237_p11)  ;;  %v307_v45 = vmul.f32 (!%p237_p11), %v1331_v42, %v1331_v42 }
  0x34   : > { %v312_v39 = vmul.f32 (!%p237_p11), %v1316_v36, %v1316_v36  ;;  %v314_v44 = vmul.f32 (!%p237_p11), %v1326_v40, %v1326_v40  ;;  %v311_v46 = vmul.f32 (!%p237_p11), %v1334_v43, %v1334_v43  ;;  %v1343_v47 = vld [vmem:[%s1310_s25 + $0x10] sm:$0xff] (!%p237_p11)  ;;  %v1349_v49 = vld [vmem:[%s1310_s25 + $0x48] sm:$0xff] (!%p237_p11)  ;;  %v1361_v55 = vld [vmem:[%s1310_s25 + $0x58] sm:$0xff] (!%p237_p11) }
  0x35   : > { %v1346_v48 = vld [vmem:[%s1310_s25 + $0x30] sm:$0xff] (!%p237_p11)  ;;  %v309_v51 = vmul.f32 (!%p237_p11), %v1343_v47, %v1343_v47  ;;  %v1356_v53 = vld [vmem:[%s1310_s25 + $0x68] sm:$0xff] (!%p237_p11)  ;;  %v316_v54 = vmul.f32 (!%p237_p11), %v1349_v49, %v1349_v49  ;;  %v1364_v56 = vld [vmem:[%s1310_s25 + $0x78] sm:$0xff] (!%p237_p11)  ;;  %v318_v60 = vmul.f32 (!%p237_p11), %v1361_v55, %v1361_v55 }
  0x36   : > { %v932_v50 = vpack.c.bf16 (!%p237_p11), %v312_v39, %v308_v38  ;;  %v313_v52 = vmul.f32 (!%p237_p11), %v1346_v48, %v1346_v48  ;;  %v948_v57 = vpack.c.bf16 (!%p237_p11), %v314_v44, %v310_v41  ;;  %v934_v58 = vpack.c.bf16 (!%p237_p11), %v311_v46, %v307_v45  ;;  %v1371_v61 = vld [vmem:[%s1310_s25 + $0x40] sm:$0xff] (!%p237_p11)  ;;  %v1377_v63 = vld [vmem:[%s1310_s25 + $0x50] sm:$0xff] (!%p237_p11)  ;;  %v1389_v5 = vld [vmem:[%s1310_s25 + $0x88] sm:$0xff] (!%p237_p11) }
  0x37   : > { %v320_v59 = vmul.f32 %v1356_v53, %v1356_v53  ;;  %v1374_v62 = vld [vmem:[%s1310_s25 + $0x60] sm:$0xff]  ;;  %v322_v1 = vmul.f32 %v1364_v56, %v1364_v56  ;;  %v315_v2 = vmul.f32 %v1371_v61, %v1371_v61  ;;  %v1386_v4 = vld [vmem:[%s1310_s25 + $0x70] sm:$0xff]  ;;  %v1392_v6 = vld [vmem:[%s1310_s25 + $0xa8] sm:$0xff]  ;;  %v317_v8 = vmul.f32 %v1377_v63, %v1377_v63  ;;  %s927_s21 = sshll.u32 (%p1214_p6), %s1126_s14, 2 }
  0x38   : > { %933 = vmatprep.subr.bf16.mxu0 %v932_v50  ;;  %v950_v0 = vpack.c.bf16 %v313_v52, %v309_v51  ;;  %v319_v3 = vmul.f32 %v1374_v62, %v1374_v62  ;;  %949 = vmatprep.subr.bf16.mxu1 %v948_v57  ;;  %v321_v9 = vmul.f32 %v1386_v4, %v1386_v4  ;;  %v1399_v10 = vld [vmem:[%s1310_s25 + $0x98] sm:$0xff]  ;;  %v1405_v12 = vld [vmem:[%s1310_s25 + $0x80] sm:$0xff]  ;;  %v1415_v18 = vld [vmem:[%s1310_s25 + $0x90] sm:$0xff] }
  0x39   : > { %935 = vmatpush1.bf16.msra.mxu0 %v934_v58  ;;  %v936_v7 = vpack.c.bf16 %v320_v59, %v316_v54  ;;  %v1402_v11 = vld [vmem:[%s1310_s25 + $0xb8] sm:$0xff]  ;;  %v952_v13 = vpack.c.bf16 %v322_v1, %v318_v60  ;;  %v324_v15 = vmul.f32 %v1389_v5, %v1389_v5  ;;  %v328_v16 = vmul.f32 %v1392_v6, %v1392_v6  ;;  %v1412_v17 = vld [vmem:[%s1310_s25 + $0xa0] sm:$0xff]  ;;  %v1418_v19 = vld [vmem:[%s1310_s25 + $0xb0] sm:$0xff] }
  0x3a   : > { %951 = vmatpush1.bf16.msra.mxu1 %v950_v0  ;;  %v938_v14 = vpack.c.bf16 %v319_v3, %v315_v2  ;;  %v954_v20 = vpack.c.bf16 %v321_v9, %v317_v8  ;;  %v326_v21 = vmul.f32 %v1399_v10, %v1399_v10  ;;  %v330_v22 = vmul.f32 %v1402_v11, %v1402_v11  ;;  %v1427_v24 = vld [vmem:[%s1310_s25 + $0xc8] sm:$0xff]  ;;  %v1433_v26 = vld [vmem:[%s1310_s25 + $0xd8] sm:$0xff]  ;;  %v1445_v33 = vld [vmem:[%s1310_s25 + $0xc0] sm:$0xff] }
  0x3b   : > { %937 = vmatprep.subr.bf16.mxu0 %v936_v7  ;;  %v323_v23 = vmul.f32 %v1405_v12, %v1405_v12  ;;  %v1430_v25 = vld [vmem:[%s1310_s25 + $0xe8] sm:$0xff]  ;;  %953 = vmatprep.subr.bf16.mxu1 %v952_v13  ;;  %v940_v27 = vpack.c.bf16 %v328_v16, %v324_v15  ;;  %v327_v28 = vmul.f32 %v1412_v17, %v1412_v17  ;;  %v1442_v31 = vld [vmem:[%s1310_s25 + $0xf8] sm:$0xff]  ;;  %v1448_v34 = vld [vmem:[%s1310_s25 + $0xe0] sm:$0xff] }
  0x3c   : > { %v325_v29 = vmul.f32 %v1415_v18, %v1415_v18  ;;  %v329_v30 = vmul.f32 %v1418_v19, %v1418_v19  ;;  %v956_v38 = vpack.c.bf16 %v330_v22, %v326_v21  ;;  %v332_v39 = vmul.f32 %v1427_v24, %v1427_v24  ;;  %v1457_v45 = vld [vmem:[%s1310_s25 + $0xd0] sm:$0xff]  ;;  %v340_v50 = vld [vmem:[%s1710_s2 + $0x8] sm:$0xff]  ;;  %v342_v7 = vld [vmem:[%s1710_s2 + $0x18] sm:$0xff] }
  0x3d   : > { %939 = vmatpush1.bf16.msra.mxu0 %v938_v14  ;;  %v336_v41 = vmul.f32 %v1430_v25, %v1430_v25  ;;  %v334_v44 = vmul.f32 %v1433_v26, %v1433_v26  ;;  %v1460_v46 = vld [vmem:[%s1310_s25 + $0xf0] sm:$0xff]  ;;  %v942_v51 = vpack.c.bf16 %v327_v28, %v323_v23  ;;  %v338_v54 = vmul.f32 %v1442_v31, %v1442_v31  ;;  %v343_v8 = vld [vmem:[%s1710_s2 + $0x20] sm:$0xff]  ;;  %v344_v14 = vld [vmem:[%s1710_s2 + $0x28] sm:$0xff]  ;;  %s928_s25 = sshll.u32 (%p1214_p6), %s1130_s15, 6 }
  0x3e   : > { %955 = vmatpush1.bf16.msra.mxu1 %v954_v20  ;;  %941 = vmatprep.subr.bf16.mxu0 %v940_v27  ;;  %v958_v52 = vpack.c.bf16 %v329_v30, %v325_v29  ;;  %v341_v57 = vld [vmem:[%s1710_s2 + $0x10] sm:$0xff]  ;;  %v331_v59 = vmul.f32 %v1445_v33, %v1445_v33  ;;  %v335_v60 = vmul.f32 %v1448_v34, %v1448_v34  ;;  %v299_v13 = vld [vmem:[%s1709_s1] sm:$0xff]  ;;  %v300_v16 = vld [vmem:[%s1709_s1 + $0x8] sm:$0xff]  ;;  %s743_s23 = sadd.s32 (%p1214_p6), %s928_s25, %s927_s21 }
  0x3f   : > { %957 = vmatprep.subr.bf16.mxu1 %v956_v38  ;;  %v944_v58 = vpack.c.bf16 %v336_v41, %v332_v39  ;;  %v333_v0 = vmul.f32 %v1457_v45, %v1457_v45  ;;  %v960_v1 = vpack.c.bf16 %v338_v54, %v334_v44  ;;  %v337_v2 = vmul.f32 %v1460_v46, %v1460_v46  ;;  %v345_v15 = vld [vmem:[%s1710_s2 + $0x30] sm:$0xff]  ;;  %v346_v20 = vld [vmem:[%s1710_s2 + $0x38] sm:$0xff]  ;;  %v303_v23 = vld [vmem:[%s1709_s1 + $0x20] sm:$0xff]  ;;  %s929_s12 = sshll.u32 (%p1214_p6), %s743_s23, 3 }
  0x40   : > { %354 = vperm.xlu0 %1022, %v340_v50   ;;  %359 = vperm.xlu1 %1023, %v341_v57   ;;  %v946_v3 = vpack.c.bf16 %v335_v60, %v331_v59  ;;  %v301_v21 = vld [vmem:[%s1709_s1 + $0x10] sm:$0xff]  ;;  %v302_v22 = vld [vmem:[%s1709_s1 + $0x18] sm:$0xff]  ;;  %v304_v27 = vld [vmem:[%s1709_s1 + $0x28] sm:$0xff]  ;;  %s1630_s29 = scalar_lea.vmem (%p1214_p6), %s1711_s3, %s929_s12 }
  0x41   : > { %943 = vmatpush1.bf16.msra.mxu0 %v942_v51  ;;  %v962_v9 = vpack.c.bf16 %v337_v2, %v333_v0  ;;  %v305_v28 = vld [vmem:[%s1709_s1 + $0x30] sm:$0xff]  ;;  %v306_v29 = vld [vmem:[%s1709_s1 + $0x38] sm:$0xff] }
  0x42   : > { %959 = vmatpush1.bf16.msra.mxu1 %v958_v52  ;;  %945 = vmatprep.subr.bf16.mxu0 %v944_v58 }
  0x43   : > { %961 = vmatprep.subr.bf16.mxu1 %v960_v1 }
  0x44   : > { %364 = vperm.xlu1 %1023, %v342_v7   ;;  %369 = vperm.xlu0 %1022, %v343_v8  }
  0x45   : > { %947 = vmatpush1.bf16.msra.mxu0 %v946_v3 }
  0x46   : > { %963 = vmatpush1.bf16.msra.mxu1 %v962_v9 }
  0x48   : > { %910 = vmatmul.mubr.msk.f32.vlgmr.msra.gmra.mrb[0].mxu0 %vm387_vm0, %v299_v13  ;;  %374 = vperm.xlu1 %1023, %v344_v14  }
  0x49   : > { %918 = vmatmul.mubr.msk.f32.vlgmr.msra.gmra.mrb[0].mxu1 %vm387_vm0, %v299_v13  ;;  %482 = vmatprep.mubr.f32.mxu0 %v1144_v32 }
  0x4a   : > { %595 = vmatprep.mubr.f32.mxu1 %v1144_v32  ;;  %379 = vperm.xlu0 %1022, %v345_v15  }
  0x4c   : > { %911 = vmatmul.mubr.msk.f32.gmra.mrb[2].mxu0 %vm387_vm0, %v300_v16  ;;  %384 = vperm.xlu1 %1023, %v346_v20  }
  0x4d   : > { %919 = vmatmul.mubr.msk.f32.gmra.mrb[2].mxu1 %vm387_vm0, %v300_v16  ;;  %488 = vmatprep.mubr.f32.mxu0 %v1144_v32 }
  0x4e   : > { %601 = vmatprep.mubr.f32.mxu1 %v1144_v32 }
  0x50   : > { %912 = vmatmul.mubr.msk.f32.gmra.mrb[4].mxu0 %vm387_vm0, %v301_v21 }
  0x51   : > { %920 = vmatmul.mubr.msk.f32.gmra.mrb[4].mxu1 %vm387_vm0, %v301_v21  ;;  %494 = vmatprep.mubr.f32.mxu0 %v1144_v32 }
  0x52   : > { %607 = vmatprep.mubr.f32.mxu1 %v1144_v32 }
  0x54   : > { %913 = vmatmul.mubr.msk.f32.gmra.mrb[6].mxu0 %vm387_vm0, %v302_v22 }
  0x55   : > { %921 = vmatmul.mubr.msk.f32.gmra.mrb[6].mxu1 %vm387_vm0, %v302_v22  ;;  %500 = vmatprep.mubr.f32.mxu0 %v1144_v32 }
  0x56   : > { %613 = vmatprep.mubr.f32.mxu1 %v1144_v32 }
  0x58   : > { %914 = vmatmul.mubr.msk.f32.gmra.mrb[8].mxu0 %vm387_vm0, %v303_v23 }
  0x59   : > { %922 = vmatmul.mubr.msk.f32.gmra.mrb[8].mxu1 %vm387_vm0, %v303_v23  ;;  %506 = vmatprep.mubr.f32.mxu0 %v1144_v32 }
  0x5a   : > { %619 = vmatprep.mubr.f32.mxu1 %v1144_v32 }
  0x5c   : > { %915 = vmatmul.mubr.msk.f32.gmra.mrb[10].mxu0 %vm387_vm0, %v304_v27 }
  0x5d   : > { %923 = vmatmul.mubr.msk.f32.gmra.mrb[10].mxu1 %vm387_vm0, %v304_v27  ;;  %512 = vmatprep.mubr.f32.mxu0 %v1144_v32 }
  0x5e   : > { %625 = vmatprep.mubr.f32.mxu1 %v1144_v32 }
  0x60   : > { %916 = vmatmul.mubr.msk.f32.gmra.mrb[12].mxu0 %vm387_vm0, %v305_v28 }
  0x61   : > { %924 = vmatmul.mubr.msk.f32.gmra.mrb[12].mxu1 %vm387_vm0, %v305_v28  ;;  %518 = vmatprep.mubr.f32.mxu0 %v1144_v32 }
  0x62   : > { %631 = vmatprep.mubr.f32.mxu1 %v1144_v32 }
  0x64   : > { %917 = vmatmul.mubr.msk.f32.gmra.mrb[14].mxu0 %vm387_vm0, %v306_v29 }
  0x65   : > { %925 = vmatmul.mubr.msk.f32.gmra.mrb[14].mxu1 %vm387_vm0, %v306_v29 }
  0xb1   : > { %v350_v30 = vpop.permute.xlu0 %349 }
  0xbf   : > { %v355_v54 = vpop.permute.xlu0 %354  ;;  %v360_v1 = vpop.permute.xlu1 %359 }
  0xc3   : > { %v365_v22 = vpop.permute.xlu1 %364 }
 0x11b   : > { %v478_v38 = vpop.f32.mrb[0].mxu0 }
 0x11c   : > { %v479_v39 = vadd.f32 %v478_v38, %v350_v30  ;;  %v591_v41 = vpop.f32.mrb[0].mxu1  ;;  %v480_v44 = vpop.f32.mrb[1].mxu0 }
 0x11d   : > { %v592_v50 = vadd.f32 %v591_v41, %v350_v30  ;;  %v481_v51 = vadd.f32 %v480_v44, %v350_v30  ;;  %v593_v52 = vpop.f32.mrb[1].mxu1 }
 0x11e   : > { %1024 = vrsqrt.f32 %v479_v39  ;;  %v594_v57 = vadd.f32 %v593_v52, %v350_v30 }
 0x11f   : > { %1026 = vrsqrt.f32 %v592_v50  ;;  %v484_v58 = vpop.f32.mrb[2].mxu0 }
 0x120   : > { %1028 = vrsqrt.f32 %v481_v51  ;;  %v485_v59 = vadd.f32 %v484_v58, %v355_v54  ;;  %v597_v32 = vpop.f32.mrb[2].mxu1  ;;  %v486_v60 = vpop.f32.mrb[3].mxu0 }
 0x121   : > { %1030 = vrsqrt.f32 %v594_v57  ;;  %v598_v0 = vadd.f32 %v597_v32, %v355_v54  ;;  %v487_v2 = vadd.f32 %v486_v60, %v355_v54  ;;  %v599_v3 = vpop.f32.mrb[3].mxu1 }
 0x122   : > { %1032 = vrsqrt.f32 %v485_v59  ;;  %v600_v7 = vadd.f32 %v599_v3, %v355_v54 }
 0x123   : > { %1034 = vrsqrt.f32 %v598_v0  ;;  %v490_v8 = vpop.f32.mrb[4].mxu0 }
 0x124   : > { %1036 = vrsqrt.f32 %v487_v2  ;;  %v491_v9 = vadd.f32 %v490_v8, %v360_v1  ;;  %v603_v13 = vpop.f32.mrb[4].mxu1  ;;  %v492_v14 = vpop.f32.mrb[5].mxu0 }
 0x125   : > { %1038 = vrsqrt.f32 %v600_v7  ;;  %v604_v15 = vadd.f32 %v603_v13, %v360_v1  ;;  %v493_v16 = vadd.f32 %v492_v14, %v360_v1  ;;  %v605_v20 = vpop.f32.mrb[5].mxu1 }
 0x126   : > { %1040 = vrsqrt.f32 %v491_v9  ;;  %v606_v21 = vadd.f32 %v605_v20, %v360_v1 }
 0x127   : > { %1042 = vrsqrt.f32 %v604_v15  ;;  %v496_v23 = vpop.f32.mrb[6].mxu0 }
 0x128   : > { %v1025_v27 = vpop.eup %1024  ;;  %1044 = vrsqrt.f32 %v493_v16  ;;  %v497_v28 = vadd.f32 %v496_v23, %v365_v22  ;;  %v609_v29 = vpop.f32.mrb[6].mxu1 }
 0x129   : > { %v498_v30 = vpop.f32.mrb[7].mxu0  ;;  %v1027_v38 = vpop.eup %1026  ;;  %v670_v39 = vmul.f32 %v1025_v27, %v1331_v42  ;;  %1046 = vrsqrt.f32 %v606_v21  ;;  %v610_v41 = vadd.f32 %v609_v29, %v365_v22 }
 0x12a   : > { %v499_v44 = vadd.f32 %v498_v30, %v365_v22  ;;  %v611_v50 = vpop.f32.mrb[7].mxu1  ;;  %v1029_v51 = vpop.eup %1028  ;;  %v672_v52 = vmul.f32 %v1027_v38, %v1343_v47  ;;  %1048 = vrsqrt.f32 %v497_v28 }
 0x12b   : > { %v612_v54 = vadd.f32 %v611_v50, %v365_v22  ;;  %v1031_v57 = vpop.eup %1030  ;;  %702 = vst [vmem:[%s1550_s24] sm:$0xff] %v670_v39  ;;  %v671_v58 = vmul.f32 %v1029_v51, %v1313_v35  ;;  %1050 = vrsqrt.f32 %v610_v41  ;;  %v370_v42 = vpop.permute.xlu0 %369 }
 0x12c   : > { %v502_v59 = vpop.f32.mrb[8].mxu0  ;;  %v1033_v32 = vpop.eup %1032  ;;  %704 = vst [vmem:[%s1550_s24 + $0x10] sm:$0xff] %v672_v52  ;;  %v673_v60 = vmul.f32 %v1031_v57, %v1319_v37  ;;  %1052 = vrsqrt.f32 %v499_v44 }
 0x12d   : > { %v503_v47 = vadd.f32 %v502_v59, %v370_v42  ;;  %v615_v0 = vpop.f32.mrb[8].mxu1  ;;  %v504_v1 = vpop.f32.mrb[9].mxu0  ;;  %703 = vst [vmem:[%s1550_s24 + $0x8] sm:$0xff] %v671_v58  ;;  %v674_v3 = vmul.f32 %v1033_v32, %v1334_v43  ;;  %1054 = vrsqrt.f32 %v612_v54 }
 0x12e   : > { %v1035_v2 = vpop.eup %1034  ;;  %v616_v35 = vadd.f32 %v615_v0, %v370_v42  ;;  %v505_v7 = vadd.f32 %v504_v1, %v370_v42  ;;  %v617_v8 = vpop.f32.mrb[9].mxu1  ;;  %705 = vst [vmem:[%s1550_s24 + $0x18] sm:$0xff] %v673_v60 }
 0x12f   : > { %v1037_v9 = vpop.eup %1036  ;;  %v676_v13 = vmul.f32 %v1035_v2, %v1346_v48  ;;  %1056 = vrsqrt.f32 %v503_v47  ;;  %v618_v37 = vadd.f32 %v617_v8, %v370_v42  ;;  %706 = vst [vmem:[%s1550_s24 + $0x20] sm:$0xff] %v674_v3  ;;  %v375_v16 = vpop.permute.xlu1 %374 }
 0x130   : > { %v1039_v14 = vpop.eup %1038  ;;  %v675_v15 = vmul.f32 %v1037_v9, %v1316_v36  ;;  %1058 = vrsqrt.f32 %v616_v35  ;;  %v508_v20 = vpop.f32.mrb[10].mxu0 }
 0x131   : > { %v1041_v43 = vpop.eup %1040  ;;  %708 = vst [vmem:[%s1550_s24 + $0x30] sm:$0xff] %v676_v13  ;;  %v677_v21 = vmul.f32 %v1039_v14, %v1326_v40  ;;  %1060 = vrsqrt.f32 %v505_v7  ;;  %v509_v22 = vadd.f32 %v508_v20, %v375_v16  ;;  %v621_v23 = vpop.f32.mrb[10].mxu1 }
 0x132   : > { %v510_v48 = vpop.f32.mrb[11].mxu0  ;;  %v1043_v27 = vpop.eup %1042  ;;  %707 = vst [vmem:[%s1550_s24 + $0x28] sm:$0xff] %v675_v15  ;;  %v678_v28 = vmul.f32 %v1041_v43, %v1371_v61  ;;  %1062 = vrsqrt.f32 %v618_v37  ;;  %v622_v36 = vadd.f32 %v621_v23, %v375_v16 }
 0x133   : > { %v511_v29 = vadd.f32 %v510_v48, %v375_v16  ;;  %v623_v30 = vpop.f32.mrb[11].mxu1  ;;  %v1045_v38 = vpop.eup %1044  ;;  %709 = vst [vmem:[%s1550_s24 + $0x38] sm:$0xff] %v677_v21  ;;  %v680_v39 = vmul.f32 %v1043_v27, %v1377_v63  ;;  %1064 = vrsqrt.f32 %v509_v22 }
 0x134   : > { %v624_v40 = vadd.f32 %v623_v30, %v375_v16  ;;  %v1047_v41 = vpop.eup %1046  ;;  %710 = vst [vmem:[%s1550_s24 + $0x40] sm:$0xff] %v678_v28  ;;  %v679_v44 = vmul.f32 %v1045_v38, %v1349_v49  ;;  %v380_v50 = vpop.permute.xlu0 %379  ;;  %1066 = vrsqrt.f32 %v622_v36 }
 0x135   : > { %v514_v51 = vpop.f32.mrb[12].mxu0  ;;  %v1049_v61 = vpop.eup %1048  ;;  %712 = vst [vmem:[%s1550_s24 + $0x50] sm:$0xff] %v680_v39  ;;  %v681_v52 = vmul.f32 %v1047_v41, %v1361_v55  ;;  %1068 = vrsqrt.f32 %v511_v29 }
 0x136   : > { %v515_v54 = vadd.f32 %v514_v51, %v380_v50  ;;  %v627_v57 = vpop.f32.mrb[12].mxu1  ;;  %v516_v63 = vpop.f32.mrb[13].mxu0  ;;  %711 = vst [vmem:[%s1550_s24 + $0x48] sm:$0xff] %v679_v44  ;;  %v682_v42 = vmul.f32 %v1049_v61, %v1374_v62  ;;  %1070 = vrsqrt.f32 %v624_v40 }
 0x137   : > { %v1051_v58 = vpop.eup %1050  ;;  %v628_v49 = vadd.f32 %v627_v57, %v380_v50  ;;  %v517_v59 = vadd.f32 %v516_v63, %v380_v50  ;;  %v629_v32 = vpop.f32.mrb[13].mxu1  ;;  %713 = vst [vmem:[%s1550_s24 + $0x58] sm:$0xff] %v681_v52 }
 0x138   : > { %v1053_v60 = vpop.eup %1052  ;;  %v684_v47 = vmul.f32 %v1051_v58, %v1386_v4  ;;  %1072 = vrsqrt.f32 %v515_v54  ;;  %v630_v55 = vadd.f32 %v629_v32, %v380_v50  ;;  %714 = vst [vmem:[%s1550_s24 + $0x60] sm:$0xff] %v682_v42  ;;  %v385_v2 = vpop.permute.xlu1 %384  ;;  %v770_v51 = vld [vmem:[%s1550_s24 + $0x30] sm:$0xff] (%p1214_p6) }
 0x139   : > { %v1055_v0 = vpop.eup %1054  ;;  %v683_v1 = vmul.f32 %v1053_v60, %v1356_v53  ;;  %1074 = vrsqrt.f32 %v628_v49  ;;  %v520_v3 = vpop.f32.mrb[14].mxu0  ;;  %v768_v50 = vld [vmem:[%s1550_s24 + $0x28] sm:$0xff] (%p1214_p6)  ;;  %771 = vst [vmem:[%s1630_s29 + $0x50] sm:$0xff] (%p1214_p6), %v770_v51 }
 0x13a   : > { %v1057_v62 = vpop.eup %1056  ;;  %716 = vst [vmem:[%s1550_s24 + $0x70] sm:$0xff] %v684_v47  ;;  %v685_v35 = vmul.f32 %v1055_v0, %v1364_v56  ;;  %1076 = vrsqrt.f32 %v517_v59  ;;  %v521_v7 = vadd.f32 %v520_v3, %v385_v2  ;;  %v633_v8 = vpop.f32.mrb[14].mxu1  ;;  %v772_v61 = vld [vmem:[%s1550_s24 + $0x38] sm:$0xff] (%p1214_p6)  ;;  %769 = vst [vmem:[%s1630_s29 + $0x48] sm:$0xff] (%p1214_p6), %v768_v50 }
 0x13b   : > { %v522_v4 = vpop.f32.mrb[15].mxu0  ;;  %v1059_v9 = vpop.eup %1058  ;;  %715 = vst [vmem:[%s1550_s24 + $0x68] sm:$0xff] %v683_v1  ;;  %v686_v13 = vmul.f32 %v1057_v62, %v1405_v12  ;;  %1078 = vrsqrt.f32 %v630_v55  ;;  %v634_v53 = vadd.f32 %v633_v8, %v385_v2  ;;  %v774_v52 = vld [vmem:[%s1550_s24 + $0x40] sm:$0xff] (%p1214_p6)  ;;  %773 = vst [vmem:[%s1630_s29 + $0x58] sm:$0xff] (%p1214_p6), %v772_v61 }
 0x13c   : > { %v523_v37 = vadd.f32 %v522_v4, %v385_v2  ;;  %v635_v14 = vpop.f32.mrb[15].mxu1  ;;  %v1061_v15 = vpop.eup %1060  ;;  %717 = vst [vmem:[%s1550_s24 + $0x78] sm:$0xff] %v685_v35  ;;  %v688_v16 = vmul.f32 %v1059_v9, %v1415_v18  ;;  %1080 = vrsqrt.f32 %v521_v7  ;;  %v778_v57 = vld [vmem:[%s1550_s24 + $0x50] sm:$0xff] (%p1214_p6)  ;;  %775 = vst [vmem:[%s1630_s29 + $0x80] sm:$0xff] (%p1214_p6), %v774_v52 }
 0x13d   : > { %v636_v56 = vadd.f32 %v635_v14, %v385_v2  ;;  %v1063_v20 = vpop.eup %1062  ;;  %718 = vst [vmem:[%s1550_s24 + $0x80] sm:$0xff] %v686_v13  ;;  %v687_v43 = vmul.f32 %v1061_v15, %v1389_v5  ;;  %1082 = vrsqrt.f32 %v634_v53  ;;  %v776_v54 = vld [vmem:[%s1550_s24 + $0x48] sm:$0xff] (%p1214_p6)  ;;  %779 = vst [vmem:[%s1630_s29 + $0x90] sm:$0xff] (%p1214_p6), %v778_v57 }
 0x13e   : > { %v1065_v12 = vpop.eup %1064  ;;  %720 = vst [vmem:[%s1550_s24 + $0x90] sm:$0xff] %v688_v16  ;;  %v689_v21 = vmul.f32 %v1063_v20, %v1399_v10  ;;  %1084 = vrsqrt.f32 %v523_v37  ;;  %v780_v63 = vld [vmem:[%s1550_s24 + $0x58] sm:$0xff] (%p1214_p6)  ;;  %777 = vst [vmem:[%s1630_s29 + $0x88] sm:$0xff] (%p1214_p6), %v776_v54 }
 0x13f   : > { %v1067_v22 = vpop.eup %1066  ;;  %719 = vst [vmem:[%s1550_s24 + $0x88] sm:$0xff] %v687_v43  ;;  %v690_v18 = vmul.f32 %v1065_v12, %v1412_v17  ;;  %1086 = vrsqrt.f32 %v636_v56  ;;  %781 = vst [vmem:[%s1630_s29 + $0x98] sm:$0xff] (%p1214_p6), %v780_v63  ;;  %v782_v58 = vld [vmem:[%s1550_s24 + $0x60] sm:$0xff] (%p1214_p6) }
 0x140   : > { %v1069_v23 = vpop.eup %1068  ;;  %721 = vst [vmem:[%s1550_s24 + $0x98] sm:$0xff] %v689_v21  ;;  %v692_v48 = vmul.f32 %v1067_v22, %v1418_v19  ;;  %783 = vst [vmem:[%s1630_s29 + $0xc0] sm:$0xff] (%p1214_p6), %v782_v58 }
 0x141   : > { %v1071_v5 = vpop.eup %1070  ;;  %722 = vst [vmem:[%s1550_s24 + $0xa0] sm:$0xff] %v690_v18  ;;  %v691_v27 = vmul.f32 %v1069_v23, %v1392_v6  ;;  %v786_v49 = vld [vmem:[%s1550_s24 + $0x70] sm:$0xff] (%p1214_p6) }
 0x142   : > { %v1073_v28 = vpop.eup %1072  ;;  %724 = vst [vmem:[%s1550_s24 + $0xb0] sm:$0xff] %v692_v48  ;;  %v693_v10 = vmul.f32 %v1071_v5, %v1402_v11  ;;  %v784_v42 = vld [vmem:[%s1550_s24 + $0x68] sm:$0xff] (%p1214_p6)  ;;  %787 = vst [vmem:[%s1630_s29 + $0xd0] sm:$0xff] (%p1214_p6), %v786_v49 }
 0x143   : > { %v1075_v36 = vpop.eup %1074  ;;  %723 = vst [vmem:[%s1550_s24 + $0xa8] sm:$0xff] %v691_v27  ;;  %v694_v17 = vmul.f32 %v1073_v28, %v1445_v33  ;;  %785 = vst [vmem:[%s1630_s29 + $0xc8] sm:$0xff] (%p1214_p6), %v784_v42  ;;  %v788_v59 = vld [vmem:[%s1550_s24 + $0x78] sm:$0xff] (%p1214_p6) }
 0x144   : > { %v1077_v29 = vpop.eup %1076  ;;  %725 = vst [vmem:[%s1550_s24 + $0xb8] sm:$0xff] %v693_v10  ;;  %v696_v19 = vmul.f32 %v1075_v36, %v1457_v45  ;;  %v790_v32 = vld [vmem:[%s1550_s24 + $0x80] sm:$0xff] (%p1214_p6)  ;;  %789 = vst [vmem:[%s1630_s29 + $0xd8] sm:$0xff] (%p1214_p6), %v788_v59 }
 0x145   : > { %v1079_v30 = vpop.eup %1078  ;;  %726 = vst [vmem:[%s1550_s24 + $0xc0] sm:$0xff] %v694_v17  ;;  %v695_v6 = vmul.f32 %v1077_v29, %v1427_v24  ;;  %791 = vst [vmem:[%s1630_s29 + $0x100] sm:$0xff] (%p1214_p6), %v790_v32  ;;  %v794_v47 = vld [vmem:[%s1550_s24 + $0x90] sm:$0xff] (%p1214_p6) }
 0x146   : > { %v1081_v38 = vpop.eup %1080  ;;  %728 = vst [vmem:[%s1550_s24 + $0xd0] sm:$0xff] %v696_v19  ;;  %v697_v11 = vmul.f32 %v1079_v30, %v1433_v26  ;;  %740 = sbr.rel (!%p1214_p6) target bundleno = 341 (0x155), region = 59  ;;  %v760_v26 = vld [vmem:[%s1550_s24 + $0x8] sm:$0xff] (%p1214_p6)  ;;  %795 = vst [vmem:[%s1630_s29 + $0x110] sm:$0xff] (%p1214_p6), %v794_v47 }
 0x147   : > { %v1083_v39 = vpop.eup %1082  ;;  %727 = vst [vmem:[%s1550_s24 + $0xc8] sm:$0xff] %v695_v6  ;;  %v698_v33 = vmul.f32 %v1081_v38, %v1448_v34  ;;  %v764_v34 = vld [vmem:[%s1550_s24 + $0x18] sm:$0xff] (%p1214_p6)  ;;  %761 = vst [vmem:[%s1630_s29 + $0x8] sm:$0xff] (%p1214_p6), %v760_v26  ;;  %v792_v60 = vld [vmem:[%s1550_s24 + $0x88] sm:$0xff] (%p1214_p6) }
 0x148   : > { %v1085_v40 = vpop.eup %1084  ;;  %729 = vst [vmem:[%s1550_s24 + $0xd8] sm:$0xff] %v697_v11  ;;  %v700_v41 = vmul.f32 %v1083_v39, %v1460_v46  ;;  %v766_v46 = vld [vmem:[%s1550_s24 + $0x20] sm:$0xff] (%p1214_p6)  ;;  %765 = vst [vmem:[%s1630_s29 + $0x18] sm:$0xff] (%p1214_p6), %v764_v34  ;;  %v796_v55 = vld [vmem:[%s1550_s24 + $0x98] sm:$0xff] (%p1214_p6) }
 0x149   : > { %v1087_v45 = vpop.eup %1086  ;;  %730 = vst [vmem:[%s1550_s24 + $0xe0] sm:$0xff] %v698_v33  ;;  %v699_v44 = vmul.f32 %v1085_v40, %v1430_v25  ;;  %v758_v25 = vld [vmem:[%s1550_s24] sm:$0xff] (%p1214_p6)  ;;  %767 = vst [vmem:[%s1630_s29 + $0x40] sm:$0xff] (%p1214_p6), %v766_v46  ;;  %v802_v2 = vld [vmem:[%s1550_s24 + $0xb0] sm:$0xff] (%p1214_p6) }
 0x14a   : > { %732 = vst [vmem:[%s1550_s24 + $0xf0] sm:$0xff] %v700_v41  ;;  %v701_v24 = vmul.f32 %v1087_v45, %v1442_v31  ;;  %v762_v31 = vld [vmem:[%s1550_s24 + $0x10] sm:$0xff] (%p1214_p6)  ;;  %759 = vst [vmem:[%s1630_s29] sm:$0xff] (%p1214_p6), %v758_v25  ;;  %v798_v0 = vld [vmem:[%s1550_s24 + $0xa0] sm:$0xff] (%p1214_p6) }
 0x14b   : > { %731 = vst [vmem:[%s1550_s24 + $0xe8] sm:$0xff] %v699_v44  ;;  %763 = vst [vmem:[%s1630_s29 + $0x10] sm:$0xff] (%p1214_p6), %v762_v31  ;;  %v800_v1 = vld [vmem:[%s1550_s24 + $0xa8] sm:$0xff] (%p1214_p6)  ;;  %v804_v3 = vld [vmem:[%s1550_s24 + $0xb8] sm:$0xff] (%p1214_p6) }
 0x14c   : > { %733 = vst [vmem:[%s1550_s24 + $0xf8] sm:$0xff] %v701_v24  ;;  %793 = vst [vmem:[%s1630_s29 + $0x108] sm:$0xff] (%p1214_p6), %v792_v60  ;;  %v806_v62 = vld [vmem:[%s1550_s24 + $0xc0] sm:$0xff] (%p1214_p6) }
 0x14d   : > { %797 = vst [vmem:[%s1630_s29 + $0x118] sm:$0xff] %v796_v55  ;;  %799 = vst [vmem:[%s1630_s29 + $0x140] sm:$0xff] %v798_v0  ;;  %v810_v7 = vld [vmem:[%s1550_s24 + $0xd0] sm:$0xff] }
 0x14e   : > { %801 = vst [vmem:[%s1630_s29 + $0x148] sm:$0xff] %v800_v1  ;;  %803 = vst [vmem:[%s1630_s29 + $0x150] sm:$0xff] %v802_v2  ;;  %v808_v35 = vld [vmem:[%s1550_s24 + $0xc8] sm:$0xff] }
 0x14f   : > { %805 = vst [vmem:[%s1630_s29 + $0x158] sm:$0xff] %v804_v3  ;;  %807 = vst [vmem:[%s1630_s29 + $0x180] sm:$0xff] %v806_v62  ;;  %v812_v8 = vld [vmem:[%s1550_s24 + $0xd8] sm:$0xff] }
 0x150   : > { %809 = vst [vmem:[%s1630_s29 + $0x188] sm:$0xff] %v808_v35  ;;  %811 = vst [vmem:[%s1630_s29 + $0x190] sm:$0xff] %v810_v7  ;;  %v814_v4 = vld [vmem:[%s1550_s24 + $0xe0] sm:$0xff] }
 0x151   : > { %813 = vst [vmem:[%s1630_s29 + $0x198] sm:$0xff] %v812_v8  ;;  %815 = vst [vmem:[%s1630_s29 + $0x1c0] sm:$0xff] %v814_v4  ;;  %v818_v13 = vld [vmem:[%s1550_s24 + $0xf0] sm:$0xff] }
 0x152   : > { %v816_v9 = vld [vmem:[%s1550_s24 + $0xe8] sm:$0xff]  ;;  %819 = vst [vmem:[%s1630_s29 + $0x1d0] sm:$0xff] %v818_v13 }
 0x153   : > { %817 = vst [vmem:[%s1630_s29 + $0x1c8] sm:$0xff] %v816_v9  ;;  %v820_v53 = vld [vmem:[%s1550_s24 + $0xf8] sm:$0xff] }
 0x154   : > { %821 = vst [vmem:[%s1630_s29 + $0x1d8] sm:$0xff] %v820_v53 }
 0x155 PF: > { %s13_s18 = sadd.s32 1, %s1142_s18   ;;  %s1713_s12 = smov %s1122_s13 }
 0x156   : > { %p10_p12 = scmp.ge.s32.totalorder %s13_s18, 6   ;;  %s1714_s13 = smov %s1222_s27 }
 0x157   : > { %s1715_s14 = smov %s1134_s16  ;;  %s1716_s15 = smov %s1138_s17 }
 0x158   : > { %s1717_s16 = smov %s1720_s19  ;;  %s1718_s17 = smov %s1724_s20 }
 0x159   :  { %12 = sbr.rel (!%p10_p12) target bundleno = 4 (0x4), region = 113 }

</bundles_post_ra>
